<compile_context>
chip_gen: v5e
topology: v5e:2x2
jax: 0.10.0
libtpu: 0.0.40
codegen_flags: <defaults>
</compile_context>

<pallas_src>
import functools

import jax
import jax.numpy as jnp
from jax.experimental import pallas as pl
from jax.experimental.pallas import tpu as pltpu


def _round_up(x, m):
    return ((x + m - 1) // m) * m


def _pad_last(a, target):
    pad = target - a.shape[-1]
    if pad:
        a = jnp.pad(a, [(0, 0)] * (a.ndim - 1) + [(0, pad)])
    return a


def _make_activation(activation):
    if activation == "lrelu":
        return lambda v: jnp.where(v > 0, v, 0.01 * v)
    if activation == "relu":
        return lambda v: jnp.maximum(v, 0.0)
    if activation == "sigmoid":
        return jax.nn.sigmoid
    if activation == "tanh":
        return jnp.tanh
    return lambda v: v  # 'linear'


def _temporalmlp_kernel(xcol_ref, wconv_ref, bconv_ref, wdense_ref, bdense_ref,
                        o_ref, *, num_layers, activation, compute_dtype):
    """One grid step = one (batch element, sequence tile).

    xcol_ref  : (1, TS, K*F)    im2col'd input slab (compute_dtype)
    wconv_ref : (K*F, Hp)       conv weight, (in, out), hidden padded to Hp
    bconv_ref : (1, Hp)         f32
    wdense_ref: (L, Hp, Hp)     dense weights, (in, out) layout
    bdense_ref: (L, 1, Hp)      f32
    o_ref     : (1, TS, Hp)     f32 output (lane-dense, sliced by the wrapper)
    """
    act = _make_activation(activation)

    x = xcol_ref[0]                                           # (TS, K*F)
    # Conv1d == one im2col matmul, f32 accumulation on the MXU.
    h = jnp.dot(x, wconv_ref[...], preferred_element_type=jnp.float32)
    h = h + bconv_ref[...]                                    # (1, Hp) broadcast
    if activation != "linear":
        h = act(h)

    # Dense stack: activation between layers, none after the last.
    for l in range(num_layers):
        h = jnp.dot(h.astype(compute_dtype), wdense_ref[l],
                    preferred_element_type=jnp.float32)
        h = h + bdense_ref[l]
        if l < num_layers - 1 and activation != "linear":
            h = act(h)

    o_ref[0] = h.astype(o_ref.dtype)


def temporalmlp_forward(x, params, *, num_lags, num_layers, activation="lrelu",
                        compute_dtype=jnp.bfloat16, seq_block=256,
                        single_buffer_weights=True):
    """x: (B, S, F) float32 -> (B, S, H) float32."""
    B, S, F = x.shape
    K = 2 * num_lags + 1
    KF = K * F
    L = num_layers
    H = params["w_conv"].shape[-1]
    Hp = _round_up(H, 128)          # lane-dense working hidden dim

    # --- sequence tiling (TS multiple of 16 keeps bf16/f32 sublane tiling happy)
    TS = max(16, _round_up(min(seq_block, S), 16))
    S_t = _round_up(S, TS)
    n_s = S_t // TS

    # --- im2col of the input (one fused XLA op chain, done once, in bf16) ---
    xc = x.astype(compute_dtype)
    xc = jnp.pad(xc, ((0, 0), (0, S_t - S), (0, 0)))           # tile-align seq
    xp = jnp.pad(xc, ((0, 0), (num_lags, num_lags), (0, 0)))   # conv 'same' zeros
    x_col = jnp.concatenate([xp[:, k:k + S_t, :] for k in range(K)], axis=-1)

    # --- weights: (in, out) layout, hidden zero-padded to Hp ---
    w_col = _pad_last(params["w_conv"].reshape(KF, H), Hp).astype(compute_dtype)
    b_conv = _pad_last(params["b_conv"].reshape(1, H), Hp).astype(jnp.float32)
    w_dense = jnp.pad(params["w_dense"],
                      ((0, 0), (0, Hp - H), (0, Hp - H))).astype(compute_dtype)
    b_dense = _pad_last(params["b_dense"].reshape(L, 1, H), Hp).astype(jnp.float32)

    kernel = functools.partial(
        _temporalmlp_kernel, num_layers=L, activation=activation,
        compute_dtype=compute_dtype)

    # Explicit VMEM budget: 2x streamed input/output blocks + weights + slack.
    csize = jnp.dtype(compute_dtype).itemsize
    w_bytes = KF * Hp * csize + Hp * 4 + L * Hp * Hp * csize + L * Hp * 4
    blk_bytes = 2 * TS * KF * csize + 2 * TS * Hp * 4
    vmem_limit = int(min(max(4 * (w_bytes + blk_bytes), 32 * 2**20), 48 * 2**20))

    def run(single_buffer):
        w_mode = {}
        if single_buffer:
            # Constant index maps -> no need to double-buffer the weights.
            w_mode = dict(pipeline_mode=pl.Buffered(buffer_count=1))
        grid_spec = pltpu.PrefetchScalarGridSpec(
            num_scalar_prefetch=0,
            grid=(B, n_s),
            in_specs=[
                pl.BlockSpec((1, TS, KF), lambda b, s: (b, s, 0)),
                pl.BlockSpec((KF, Hp), lambda b, s: (0, 0), **w_mode),
                pl.BlockSpec((1, Hp), lambda b, s: (0, 0), **w_mode),
                pl.BlockSpec((L, Hp, Hp), lambda b, s: (0, 0, 0), **w_mode),
                pl.BlockSpec((L, 1, Hp), lambda b, s: (0, 0, 0), **w_mode),
            ],
            out_specs=pl.BlockSpec((1, TS, Hp), lambda b, s: (b, s, 0)),
        )
        return pl.pallas_call(
            kernel,
            out_shape=jax.ShapeDtypeStruct((B, S_t, Hp), jnp.float32),
            grid_spec=grid_spec,
            compiler_params=pltpu.CompilerParams(
                dimension_semantics=("parallel", "parallel"),
                vmem_limit_bytes=vmem_limit),
        )(x_col, w_col, b_conv, w_dense, b_dense)

    if single_buffer_weights:
        try:
            out = jax.block_until_ready(run(True))
        except Exception:
            # pipeline_mode / Buffered(1) not supported by this Pallas build:
            # fall back to default double-buffered weights.
            out = run(False)
    else:
        out = run(False)

    return out[:, :S, :H]


def init_params(key, input_size, num_hid_units, num_layers, num_lags):
    """Deterministic parameter init (PyTorch-style uniform bounds)."""
    K = 2 * num_lags + 1
    keys = jax.random.split(key, 2 + 2 * num_layers)
    # Conv1d default init bound: 1/sqrt(in_channels * kernel_size)
    bound_c = 1.0 / jnp.sqrt(input_size * K)
    # torch weight is (H, C, K); we store per-tap (in, out): (K, C, H)
    w_conv = jax.random.uniform(
        keys[0], (K, input_size, num_hid_units), jnp.float32,
        minval=-bound_c, maxval=bound_c)
    b_conv = jax.random.uniform(
        keys[1], (1, num_hid_units), jnp.float32,
        minval=-bound_c, maxval=bound_c)
    # Linear default init bound: 1/sqrt(in_features)
    bound_l = 1.0 / jnp.sqrt(num_hid_units)
    w_dense = jnp.stack([
        jax.random.uniform(keys[2 + 2 * i], (num_hid_units, num_hid_units),
                           jnp.float32, minval=-bound_l, maxval=bound_l)
        for i in range(num_layers)])
    b_dense = jnp.stack([
        jax.random.uniform(keys[3 + 2 * i], (1, num_hid_units),
                           jnp.float32, minval=-bound_l, maxval=bound_l)
        for i in range(num_layers)])
    return {"w_conv": w_conv, "b_conv": b_conv,
            "w_dense": w_dense, "b_dense": b_dense}


def reference_forward(x, params, *, num_lags, num_layers, activation="lrelu"):
    """Pure-JAX f32 reference matching PyTorch semantics."""
    S = x.shape[1]
    K = 2 * num_lags + 1
    xp = jnp.pad(x, ((0, 0), (num_lags, num_lags), (0, 0)))
    out = jnp.zeros((x.shape[0], S, params["w_conv"].shape[-1]))
    out = out + params["b_conv"][None, :, :]
    for k in range(K):
        out = out + jnp.einsum("bsf,fh->bsh", xp[:, k:k + S, :],
                               params["w_conv"][k])
    act = _make_activation(activation)
    if activation != "linear":
        out = act(out)
    for l in range(num_layers):
        out = jnp.einsum("bsh,hk->bsk", out, params["w_dense"][l]) \
              + params["b_dense"][l][None, :, :]
        if l < num_layers - 1 and activation != "linear":
            out = act(out)
    return out


if __name__ == "__main__":
    # Small shapes consistent with the module's (batch, sequence, features) input.
    batch, seq, feats = 2, 32, 4
    num_hid_units, num_layers, num_lags = 32, 3, 2
    activation = "lrelu"

    key = jax.random.PRNGKey(0)
    kx, kp = jax.random.split(key)
    x = jax.random.normal(kx, (batch, seq, feats), jnp.float32)
    params = init_params(kp, feats, num_hid_units, num_layers, num_lags)

    ref = reference_forward(
        x, params, num_lags=num_lags, num_layers=num_layers,
        activation=activation)

    # 1) f32 compute path with explicit sequence tiling (TS=16 -> grid (2,2)):
    #    tight semantic check of im2col conv, halo padding, hidden padding.
    out_f32 = temporalmlp_forward(
        x, params, num_lags=num_lags, num_layers=num_layers,
        activation=activation, compute_dtype=jnp.float32, seq_block=16)
    out_f32 = jax.block_until_ready(out_f32)
    assert out_f32.shape == (batch, seq, num_hid_units)
    assert jnp.allclose(out_f32, ref, atol=1e-4, rtol=1e-4)

    # 2) default fast path: bf16 matmul operands, f32 accumulation (loose check).
    out_bf16 = temporalmlp_forward(
        x, params, num_lags=num_lags, num_layers=num_layers,
        activation=activation)
    out_bf16 = jax.block_until_ready(out_bf16)
    assert out_bf16.shape == (batch, seq, num_hid_units)
    assert jnp.allclose(out_bf16, ref, atol=1e-1, rtol=1e-1)

    print("KERNEL_OK")
</pallas_src>

<mosaic_0001>
module attributes {stable_mosaic.version = 11 : i64} {
  func.func @_temporalmlp_kernel(%arg0: i32, %arg1: i32, %arg2: memref<1x16x20xf32, #tpu.memory_space<vmem>>, %arg3: memref<20x128xf32, #tpu.memory_space<vmem>>, %arg4: memref<1x128xf32, #tpu.memory_space<vmem>>, %arg5: memref<3x128x128xf32, #tpu.memory_space<vmem>>, %arg6: memref<3x1x128xf32, #tpu.memory_space<vmem>>, %arg7: memref<1x16x128xf32, #tpu.memory_space<vmem>>) attributes {dimension_semantics = [#tpu.dimension_semantics<parallel>, #tpu.dimension_semantics<parallel>], iteration_bounds = array<i64: 2, 2>, scalar_prefetch = 0 : i64, scratch_operands = 0 : i64, tpu.core_type = #tpu.core_type<tc>, window_params = [{transform_indices = @transform_0, window_bounds = array<i64: 1, 16, 20>}, {pipeline_mode = #tpu.pipeline_mode<synchronous>, transform_indices = @transform_1, window_bounds = array<i64: 20, 128>}, {pipeline_mode = #tpu.pipeline_mode<synchronous>, transform_indices = @transform_2, window_bounds = array<i64: 1, 128>}, {pipeline_mode = #tpu.pipeline_mode<synchronous>, transform_indices = @transform_3, window_bounds = array<i64: 3, 128, 128>}, {pipeline_mode = #tpu.pipeline_mode<synchronous>, transform_indices = @transform_4, window_bounds = array<i64: 3, 1, 128>}, {transform_indices = @transform_5, window_bounds = array<i64: 1, 16, 128>}]} {
    %c0 = arith.constant 0 : index
    %c0_0 = arith.constant 0 : index
    %c0_1 = arith.constant 0 : index
    %0 = vector.load %arg2[%c0, %c0_0, %c0_1] : memref<1x16x20xf32, #tpu.memory_space<vmem>>, vector<1x16x20xf32>
    %1 = vector.shape_cast %0 : vector<1x16x20xf32> to vector<16x20xf32>
    %c0_2 = arith.constant 0 : index
    %c0_3 = arith.constant 0 : index
    %2 = vector.load %arg3[%c0_2, %c0_3] : memref<20x128xf32, #tpu.memory_space<vmem>>, vector<20x128xf32>
    %cst = arith.constant dense<0.000000e+00> : vector<16x128xf32>
    %3 = tpu.matmul %1, %2, %cst {dimension_numbers = #tpu.dot_dimension_numbers<[1], [0], [0], [1], [0, 0, 1, 1], [], []>} : vector<16x20xf32>, vector<20x128xf32>, vector<16x128xf32> -> vector<16x128xf32>
    %c0_4 = arith.constant 0 : index
    %c0_5 = arith.constant 0 : index
    %4 = vector.load %arg4[%c0_4, %c0_5] : memref<1x128xf32, #tpu.memory_space<vmem>>, vector<1x128xf32>
    %5 = vector.broadcast %4 : vector<1x128xf32> to vector<16x128xf32>
    %6 = arith.addf %3, %5 : vector<16x128xf32>
    %cst_6 = arith.constant 0.000000e+00 : f32
    %7 = vector.broadcast %cst_6 : f32 to vector<16x128xf32>
    %8 = arith.cmpf ogt, %6, %7 : vector<16x128xf32>
    %cst_7 = arith.constant 0.00999999977 : f32
    %9 = vector.broadcast %cst_7 : f32 to vector<16x128xf32>
    %10 = arith.mulf %9, %6 : vector<16x128xf32>
    %11 = arith.select %8, %6, %10 : vector<16x128xi1>, vector<16x128xf32>
    %c0_8 = arith.constant 0 : index
    %c0_9 = arith.constant 0 : index
    %c0_10 = arith.constant 0 : index
    %12 = vector.load %arg5[%c0_8, %c0_9, %c0_10] : memref<3x128x128xf32, #tpu.memory_space<vmem>>, vector<1x128x128xf32>
    %13 = vector.shape_cast %12 : vector<1x128x128xf32> to vector<128x128xf32>
    %cst_11 = arith.constant dense<0.000000e+00> : vector<16x128xf32>
    %14 = tpu.matmul %11, %13, %cst_11 {dimension_numbers = #tpu.dot_dimension_numbers<[1], [0], [0], [1], [0, 0, 1, 1], [], []>} : vector<16x128xf32>, vector<128x128xf32>, vector<16x128xf32> -> vector<16x128xf32>
    %c0_12 = arith.constant 0 : index
    %c0_13 = arith.constant 0 : index
    %c0_14 = arith.constant 0 : index
    %15 = vector.load %arg6[%c0_12, %c0_13, %c0_14] : memref<3x1x128xf32, #tpu.memory_space<vmem>>, vector<1x1x128xf32>
    %16 = vector.shape_cast %15 : vector<1x1x128xf32> to vector<1x128xf32>
    %17 = vector.broadcast %16 : vector<1x128xf32> to vector<16x128xf32>
    %18 = arith.addf %14, %17 : vector<16x128xf32>
    %cst_15 = arith.constant 0.000000e+00 : f32
    %19 = vector.broadcast %cst_15 : f32 to vector<16x128xf32>
    %20 = arith.cmpf ogt, %18, %19 : vector<16x128xf32>
    %cst_16 = arith.constant 0.00999999977 : f32
    %21 = vector.broadcast %cst_16 : f32 to vector<16x128xf32>
    %22 = arith.mulf %21, %18 : vector<16x128xf32>
    %23 = arith.select %20, %18, %22 : vector<16x128xi1>, vector<16x128xf32>
    %c1 = arith.constant 1 : index
    %c0_17 = arith.constant 0 : index
    %c0_18 = arith.constant 0 : index
    %24 = vector.load %arg5[%c1, %c0_17, %c0_18] : memref<3x128x128xf32, #tpu.memory_space<vmem>>, vector<1x128x128xf32>
    %25 = vector.shape_cast %24 : vector<1x128x128xf32> to vector<128x128xf32>
    %cst_19 = arith.constant dense<0.000000e+00> : vector<16x128xf32>
    %26 = tpu.matmul %23, %25, %cst_19 {dimension_numbers = #tpu.dot_dimension_numbers<[1], [0], [0], [1], [0, 0, 1, 1], [], []>} : vector<16x128xf32>, vector<128x128xf32>, vector<16x128xf32> -> vector<16x128xf32>
    %c1_20 = arith.constant 1 : index
    %c0_21 = arith.constant 0 : index
    %c0_22 = arith.constant 0 : index
    %27 = vector.load %arg6[%c1_20, %c0_21, %c0_22] : memref<3x1x128xf32, #tpu.memory_space<vmem>>, vector<1x1x128xf32>
    %28 = vector.shape_cast %27 : vector<1x1x128xf32> to vector<1x128xf32>
    %29 = vector.broadcast %28 : vector<1x128xf32> to vector<16x128xf32>
    %30 = arith.addf %26, %29 : vector<16x128xf32>
    %cst_23 = arith.constant 0.000000e+00 : f32
    %31 = vector.broadcast %cst_23 : f32 to vector<16x128xf32>
    %32 = arith.cmpf ogt, %30, %31 : vector<16x128xf32>
    %cst_24 = arith.constant 0.00999999977 : f32
    %33 = vector.broadcast %cst_24 : f32 to vector<16x128xf32>
    %34 = arith.mulf %33, %30 : vector<16x128xf32>
    %35 = arith.select %32, %30, %34 : vector<16x128xi1>, vector<16x128xf32>
    %c2 = arith.constant 2 : index
    %c0_25 = arith.constant 0 : index
    %c0_26 = arith.constant 0 : index
    %36 = vector.load %arg5[%c2, %c0_25, %c0_26] : memref<3x128x128xf32, #tpu.memory_space<vmem>>, vector<1x128x128xf32>
    %37 = vector.shape_cast %36 : vector<1x128x128xf32> to vector<128x128xf32>
    %cst_27 = arith.constant dense<0.000000e+00> : vector<16x128xf32>
    %38 = tpu.matmul %35, %37, %cst_27 {dimension_numbers = #tpu.dot_dimension_numbers<[1], [0], [0], [1], [0, 0, 1, 1], [], []>} : vector<16x128xf32>, vector<128x128xf32>, vector<16x128xf32> -> vector<16x128xf32>
    %c2_28 = arith.constant 2 : index
    %c0_29 = arith.constant 0 : index
    %c0_30 = arith.constant 0 : index
    %39 = vector.load %arg6[%c2_28, %c0_29, %c0_30] : memref<3x1x128xf32, #tpu.memory_space<vmem>>, vector<1x1x128xf32>
    %40 = vector.shape_cast %39 : vector<1x1x128xf32> to vector<1x128xf32>
    %41 = vector.broadcast %40 : vector<1x128xf32> to vector<16x128xf32>
    %42 = arith.addf %38, %41 : vector<16x128xf32>
    %c0_31 = arith.constant 0 : index
    %c0_32 = arith.constant 0 : index
    %c0_33 = arith.constant 0 : index
    %43 = vector.load %arg7[%c0_31, %c0_32, %c0_33] : memref<1x16x128xf32, #tpu.memory_space<vmem>>, vector<1x16x128xf32>
    %44 = vector.shape_cast %43 : vector<1x16x128xf32> to vector<16x128xf32>
    %45 = vector.shape_cast %42 : vector<16x128xf32> to vector<1x16x128xf32>
    tpu.vector_store %arg7[%c0_31, %c0_32, %c0_33], %45 {strides = array<i32>} : memref<1x16x128xf32, #tpu.memory_space<vmem>>, vector<1x16x128xf32>,
    return
  }
  func.func @transform_0(%arg0: i32, %arg1: i32) -> (i32, i32, i32) {
    %c0_i32 = arith.constant 0 : i32
    %c0_i32_0 = arith.constant 0 : i32
    return %arg0, %arg1, %c0_i32 : i32, i32, i32
  }
  func.func @transform_1(%arg0: i32, %arg1: i32) -> (i32, i32) {
    %c0_i32 = arith.constant 0 : i32
    %c0_i32_0 = arith.constant 0 : i32
    %c0_i32_1 = arith.constant 0 : i32
    return %c0_i32, %c0_i32_0 : i32, i32
  }
  func.func @transform_2(%arg0: i32, %arg1: i32) -> (i32, i32) {
    %c0_i32 = arith.constant 0 : i32
    %c0_i32_0 = arith.constant 0 : i32
    %c0_i32_1 = arith.constant 0 : i32
    return %c0_i32, %c0_i32_0 : i32, i32
  }
  func.func @transform_3(%arg0: i32, %arg1: i32) -> (i32, i32, i32) {
    %c0_i32 = arith.constant 0 : i32
    %c0_i32_0 = arith.constant 0 : i32
    %c0_i32_1 = arith.constant 0 : i32
    %c0_i32_2 = arith.constant 0 : i32
    return %c0_i32, %c0_i32_0, %c0_i32_1 : i32, i32, i32
  }
  func.func @transform_4(%arg0: i32, %arg1: i32) -> (i32, i32, i32) {
    %c0_i32 = arith.constant 0 : i32
    %c0_i32_0 = arith.constant 0 : i32
    %c0_i32_1 = arith.constant 0 : i32
    %c0_i32_2 = arith.constant 0 : i32
    return %c0_i32, %c0_i32_0, %c0_i32_1 : i32, i32, i32
  }
  func.func @transform_5(%arg0: i32, %arg1: i32) -> (i32, i32, i32) {
    %c0_i32 = arith.constant 0 : i32
    %c0_i32_0 = arith.constant 0 : i32
    return %arg0, %arg1, %c0_i32 : i32, i32, i32
  }
}

module attributes {stable_mosaic.version = 11 : i64} {
  func.func @_temporalmlp_kernel(%arg0: i32, %arg1: i32, %arg2: memref<1x16x20xf32, #tpu.memory_space<vmem>>, %arg3: memref<20x128xf32, #tpu.memory_space<vmem>>, %arg4: memref<1x128xf32, #tpu.memory_space<vmem>>, %arg5: memref<3x128x128xf32, #tpu.memory_space<vmem>>, %arg6: memref<3x1x128xf32, #tpu.memory_space<vmem>>, %arg7: memref<1x16x128xf32, #tpu.memory_space<vmem>>) attributes {dimension_semantics = [#tpu.dimension_semantics<parallel>, #tpu.dimension_semantics<parallel>], iteration_bounds = array<i64: 2, 2>, scalar_prefetch = 0 : i64, scratch_operands = 0 : i64, tpu.core_type = #tpu.core_type<tc>, window_params = [{transform_indices = @transform_0, window_bounds = array<i64: 1, 16, 20>}, {pipeline_mode = #tpu.pipeline_mode<synchronous>, transform_indices = @transform_1, window_bounds = array<i64: 20, 128>}, {pipeline_mode = #tpu.pipeline_mode<synchronous>, transform_indices = @transform_2, window_bounds = array<i64: 1, 128>}, {pipeline_mode = #tpu.pipeline_mode<synchronous>, transform_indices = @transform_3, window_bounds = array<i64: 3, 128, 128>}, {pipeline_mode = #tpu.pipeline_mode<synchronous>, transform_indices = @transform_4, window_bounds = array<i64: 3, 1, 128>}, {transform_indices = @transform_5, window_bounds = array<i64: 1, 16, 128>}]} {
    %c0 = arith.constant 0 : index
    %c0_0 = arith.constant 0 : index
    %c0_1 = arith.constant 0 : index
    %0 = vector.load %arg2[%c0, %c0_0, %c0_1] : memref<1x16x20xf32, #tpu.memory_space<vmem>>, vector<1x16x20xf32>
    %1 = vector.shape_cast %0 : vector<1x16x20xf32> to vector<16x20xf32>
    %c0_2 = arith.constant 0 : index
    %c0_3 = arith.constant 0 : index
    %2 = vector.load %arg3[%c0_2, %c0_3] : memref<20x128xf32, #tpu.memory_space<vmem>>, vector<20x128xf32>
    %cst = arith.constant dense<0.000000e+00> : vector<16x128xf32>
    %3 = tpu.matmul %1, %2, %cst {dimension_numbers = #tpu.dot_dimension_numbers<[1], [0], [0], [1], [0, 0, 1, 1], [], []>} : vector<16x20xf32>, vector<20x128xf32>, vector<16x128xf32> -> vector<16x128xf32>
    %c0_4 = arith.constant 0 : index
    %c0_5 = arith.constant 0 : index
    %4 = vector.load %arg4[%c0_4, %c0_5] : memref<1x128xf32, #tpu.memory_space<vmem>>, vector<1x128xf32>
    %5 = vector.broadcast %4 : vector<1x128xf32> to vector<16x128xf32>
    %6 = arith.addf %3, %5 : vector<16x128xf32>
    %cst_6 = arith.constant 0.000000e+00 : f32
    %7 = vector.broadcast %cst_6 : f32 to vector<16x128xf32>
    %8 = arith.cmpf ogt, %6, %7 : vector<16x128xf32>
    %cst_7 = arith.constant 0.00999999977 : f32
    %9 = vector.broadcast %cst_7 : f32 to vector<16x128xf32>
    %10 = arith.mulf %9, %6 : vector<16x128xf32>
    %11 = arith.select %8, %6, %10 : vector<16x128xi1>, vector<16x128xf32>
    %c0_8 = arith.constant 0 : index
    %c0_9 = arith.constant 0 : index
    %c0_10 = arith.constant 0 : index
    %12 = vector.load %arg5[%c0_8, %c0_9, %c0_10] : memref<3x128x128xf32, #tpu.memory_space<vmem>>, vector<1x128x128xf32>
    %13 = vector.shape_cast %12 : vector<1x128x128xf32> to vector<128x128xf32>
    %cst_11 = arith.constant dense<0.000000e+00> : vector<16x128xf32>
    %14 = tpu.matmul %11, %13, %cst_11 {dimension_numbers = #tpu.dot_dimension_numbers<[1], [0], [0], [1], [0, 0, 1, 1], [], []>} : vector<16x128xf32>, vector<128x128xf32>, vector<16x128xf32> -> vector<16x128xf32>
    %c0_12 = arith.constant 0 : index
    %c0_13 = arith.constant 0 : index
    %c0_14 = arith.constant 0 : index
    %15 = vector.load %arg6[%c0_12, %c0_13, %c0_14] : memref<3x1x128xf32, #tpu.memory_space<vmem>>, vector<1x1x128xf32>
    %16 = vector.shape_cast %15 : vector<1x1x128xf32> to vector<1x128xf32>
    %17 = vector.broadcast %16 : vector<1x128xf32> to vector<16x128xf32>
    %18 = arith.addf %14, %17 : vector<16x128xf32>
    %cst_15 = arith.constant 0.000000e+00 : f32
    %19 = vector.broadcast %cst_15 : f32 to vector<16x128xf32>
    %20 = arith.cmpf ogt, %18, %19 : vector<16x128xf32>
    %cst_16 = arith.constant 0.00999999977 : f32
    %21 = vector.broadcast %cst_16 : f32 to vector<16x128xf32>
    %22 = arith.mulf %21, %18 : vector<16x128xf32>
    %23 = arith.select %20, %18, %22 : vector<16x128xi1>, vector<16x128xf32>
    %c1 = arith.constant 1 : index
    %c0_17 = arith.constant 0 : index
    %c0_18 = arith.constant 0 : index
    %24 = vector.load %arg5[%c1, %c0_17, %c0_18] : memref<3x128x128xf32, #tpu.memory_space<vmem>>, vector<1x128x128xf32>
    %25 = vector.shape_cast %24 : vector<1x128x128xf32> to vector<128x128xf32>
    %cst_19 = arith.constant dense<0.000000e+00> : vector<16x128xf32>
    %26 = tpu.matmul %23, %25, %cst_19 {dimension_numbers = #tpu.dot_dimension_numbers<[1], [0], [0], [1], [0, 0, 1, 1], [], []>} : vector<16x128xf32>, vector<128x128xf32>, vector<16x128xf32> -> vector<16x128xf32>
    %c1_20 = arith.constant 1 : index
    %c0_21 = arith.constant 0 : index
    %c0_22 = arith.constant 0 : index
    %27 = vector.load %arg6[%c1_20, %c0_21, %c0_22] : memref<3x1x128xf32, #tpu.memory_space<vmem>>, vector<1x1x128xf32>
    %28 = vector.shape_cast %27 : vector<1x1x128xf32> to vector<1x128xf32>
    %29 = vector.broadcast %28 : vector<1x128xf32> to vector<16x128xf32>
    %30 = arith.addf %26, %29 : vector<16x128xf32>
    %cst_23 = arith.constant 0.000000e+00 : f32
    %31 = vector.broadcast %cst_23 : f32 to vector<16x128xf32>
    %32 = arith.cmpf ogt, %30, %31 : vector<16x128xf32>
    %cst_24 = arith.constant 0.00999999977 : f32
    %33 = vector.broadcast %cst_24 : f32 to vector<16x128xf32>
    %34 = arith.mulf %33, %30 : vector<16x128xf32>
    %35 = arith.select %32, %30, %34 : vector<16x128xi1>, vector<16x128xf32>
    %c2 = arith.constant 2 : index
    %c0_25 = arith.constant 0 : index
    %c0_26 = arith.constant 0 : index
    %36 = vector.load %arg5[%c2, %c0_25, %c0_26] : memref<3x128x128xf32, #tpu.memory_space<vmem>>, vector<1x128x128xf32>
    %37 = vector.shape_cast %36 : vector<1x128x128xf32> to vector<128x128xf32>
    %cst_27 = arith.constant dense<0.000000e+00> : vector<16x128xf32>
    %38 = tpu.matmul %35, %37, %cst_27 {dimension_numbers = #tpu.dot_dimension_numbers<[1], [0], [0], [1], [0, 0, 1, 1], [], []>} : vector<16x128xf32>, vector<128x128xf32>, vector<16x128xf32> -> vector<16x128xf32>
    %c2_28 = arith.constant 2 : index
    %c0_29 = arith.constant 0 : index
    %c0_30 = arith.constant 0 : index
    %39 = vector.load %arg6[%c2_28, %c0_29, %c0_30] : memref<3x1x128xf32, #tpu.memory_space<vmem>>, vector<1x1x128xf32>
    %40 = vector.shape_cast %39 : vector<1x1x128xf32> to vector<1x128xf32>
    %41 = vector.broadcast %40 : vector<1x128xf32> to vector<16x128xf32>
    %42 = arith.addf %38, %41 : vector<16x128xf32>
    %c0_31 = arith.constant 0 : index
    %c0_32 = arith.constant 0 : index
    %c0_33 = arith.constant 0 : index
    %43 = vector.load %arg7[%c0_31, %c0_32, %c0_33] : memref<1x16x128xf32, #tpu.memory_space<vmem>>, vector<1x16x128xf32>
    %44 = vector.shape_cast %43 : vector<1x16x128xf32> to vector<16x128xf32>
    %45 = vector.shape_cast %42 : vector<16x128xf32> to vector<1x16x128xf32>
    tpu.vector_store %arg7[%c0_31, %c0_32, %c0_33], %45 {strides = array<i32>} : memref<1x16x128xf32, #tpu.memory_space<vmem>>, vector<1x16x128xf32>,
    return
  }
  func.func @transform_0(%arg0: i32, %arg1: i32) -> (i32, i32, i32) {
    %c0_i32 = arith.constant 0 : i32
    %c0_i32_0 = arith.constant 0 : i32
    return %arg0, %arg1, %c0_i32 : i32, i32, i32
  }
  func.func @transform_1(%arg0: i32, %arg1: i32) -> (i32, i32) {
    %c0_i32 = arith.constant 0 : i32
    %c0_i32_0 = arith.constant 0 : i32
    %c0_i32_1 = arith.constant 0 : i32
    return %c0_i32, %c0_i32_0 : i32, i32
  }
  func.func @transform_2(%arg0: i32, %arg1: i32) -> (i32, i32) {
    %c0_i32 = arith.constant 0 : i32
    %c0_i32_0 = arith.constant 0 : i32
    %c0_i32_1 = arith.constant 0 : i32
    return %c0_i32, %c0_i32_0 : i32, i32
  }
  func.func @transform_3(%arg0: i32, %arg1: i32) -> (i32, i32, i32) {
    %c0_i32 = arith.constant 0 : i32
    %c0_i32_0 = arith.constant 0 : i32
    %c0_i32_1 = arith.constant 0 : i32
    %c0_i32_2 = arith.constant 0 : i32
    return %c0_i32, %c0_i32_0, %c0_i32_1 : i32, i32, i32
  }
  func.func @transform_4(%arg0: i32, %arg1: i32) -> (i32, i32, i32) {
    %c0_i32 = arith.constant 0 : i32
    %c0_i32_0 = arith.constant 0 : i32
    %c0_i32_1 = arith.constant 0 : i32
    %c0_i32_2 = arith.constant 0 : i32
    return %c0_i32, %c0_i32_0, %c0_i32_1 : i32, i32, i32
  }
  func.func @transform_5(%arg0: i32, %arg1: i32) -> (i32, i32, i32) {
    %c0_i32 = arith.constant 0 : i32
    %c0_i32_0 = arith.constant 0 : i32
    return %arg0, %arg1, %c0_i32 : i32, i32, i32
  }
}

</mosaic_0001>

<bundles_post_ra>
// kernel: tpu_custom_call.1
= control target key start
LH: loop header
LB: loop body
LE: loop exit
PB: predicated region body
PF: predicated region fallthrough
CT: control target
= control target key end

     0   :  { %s1041_s0 = inlined_call_operand.vmem [shape: f32[2,32,20], index: 0, kind: input, shape index: {}]   ;;  %s1042_s1 = inlined_call_operand.vmem [shape: f32[20,128], index: 1, kind: input, shape index: {}]   ;;  %s1043_s2 = inlined_call_operand.vmem [shape: f32[1,128], index: 2, kind: input, shape index: {}]   ;;  %s1044_s3 = inlined_call_operand.hbm [shape: f32[3,128,128], index: 3, kind: input, shape index: {}]   ;;  %s1045_s4 = inlined_call_operand.vmem [shape: f32[3,1,128], index: 4, kind: input, shape index: {}]   ;;  %s1046_s5 = inlined_call_operand.hbm [shape: f32[2,32,128], index: 5, kind: output, shape index: {}]  }
   0x1   :  { %1048 = sst [smem:[#allocation9_spill]] %s1044_s3 }
   0x2   :  { %10 = vsyncpa [#allocation3], 0 }
   0x3   :  { %11 = vsyncpa [#allocation4], 0 }
   0x4   :  { %13 = vsyncpa [#allocation4 + $0x1], 0  ;;  %s872_s18 = smov 0   ;;  %s874_s19 = smov 0  }
   0x5   :  { %s876_s20 = smov 0   ;;  %s878_s21 = smov 0  }
   0x6   :  { %s880_s22 = smov 0   ;;  %s882_s23 = smov 0  }
   0x7   :  { %s884_s24 = smov 0   ;;  %s886_s25 = smov 0  }
   0x8 LB: > { %s579_s26 = sadd.s32 4294967295, %s835_s25   ;;  %s580_s27 = sadd.s32 4294967294, %s835_s25   ;;  %s835_s25 = sphi %s886_s25, %s19_s25   ;;  %s831_s24 = sphi %s884_s24, %s1062_s24   ;;  %s827_s23 = sphi %s882_s23, %s1061_s23   ;;  %s823_s22 = sphi %s880_s22, %s1060_s22   ;;  %s819_s21 = sphi %s878_s21, %s1059_s21   ;;  %s815_s20 = sphi %s876_s20, %s1058_s20   ;;  %s811_s19 = sphi %s874_s19, %s1057_s19   ;;  %s807_s18 = sphi %s872_s18, %s1056_s18  }
   0x9   : > { %s28_s28 = sadd.s32 1, %s827_s23  ;;  %s31_s29 = sadd.s32 1, %s831_s24 }
   0xa   : > { %p29_p0 = scmp.ge.s32.totalorder %s28_s28, 2  ;;  %s152_s30 = sadd.s32 1, %s815_s20 }
   0xb   : > { %p162_p1 = scmp.ne.s32.totalorder %s815_s20, %s811_s19  ;;  %p163_p2 = scmp.eq.s32.totalorder %s579_s26, 3 }
   0xc   : > { %s1064_s28 = smov (%p29_p0, %s28_s28), 0  ;;  %s1066_s29 = smov (!%p29_p0, %s31_s29), %s831_s24 }
   0xd   : > { %s148_s6 = ssub.s32 %s827_s23, %s1064_s28  ;;  %p924_p3 = por %p163_p2, %p162_p1 }
   0xe   : > { %p33_p4 = scmp.ge.s32.totalorder %s1066_s29, 2  ;;  %p168_p5 = scmp.ne.s32.totalorder %s811_s19, %s807_s18 }
   0xf   : > { %p169_p6 = scmp.eq.s32.totalorder %s580_s27, 3  ;;  %p581_p7 = scmp.ge.s32.totalorder %s835_s25, 1 }
  0x10   : > { %s1068_s29 = smov (%p33_p4, %s1066_s29), 0  ;;  %p176_p9 = scmp.lt.s32.totalorder %s835_s25, 5 }
  0x11   : > { %1050 = sst [smem:[#allocation8_spill]] %s1068_s29  ;;  %p933_p8 = por %p169_p6, %p168_p5 }
  0x12   : > { %s147_s9 = ssub.s32 %s831_s24, %s1068_s29  ;;  %p940_p10 = pnand %p581_p7, %p176_p9 }
  0x13   : > { %s149_s10 = sor.u32 %s148_s6, %s147_s9  ;;  %p944_p12 = scmp.eq.s32.totalorder %s579_s26, 0 }
  0x14   : > { %p150_p11 = scmp.eq.s32.totalorder %s149_s10, 0  ;;  %p623_p13 = pneg %p940_p10 }
  0x15   : > { %s1054_s3 = sld [smem:[#allocation9_spill]]  ;;  %s837_s17 = smov [#allocation2]  }
  0x16   : > { %s954_s16 = scalar_select %p150_p11, %s815_s20, %s152_s30  }
  0x17   : > { %s195_s27 = sshll.u32 %s837_s17, 4  ;;  %p624_p0 = pnand %p944_p12, %p623_p13  ;;  %s196_s27 = int_to_ptr.vmem [resolvable:$true] %s195_s27 }
  0x18   : > { %s838_s6 = smov 128   ;;  %s839_s26 = smov 8  }
  0x19   : > { %227 = sbr.rel (%p940_p10) target bundleno = 585 (0x249), region = 40 }
  0x1b   : > { %s193_s15 = sshll.u32 %s1054_s3, 4  ;;  %s194_s15 = int_to_ptr.hbm [resolvable:$true] %s193_s15 }
  0x1c   : > { %626 = dma.hbm_to_vmem [thread:$0]  (!%p624_p0), %s194_s15, 6144, %s196_s27, [#allocation3], %s838_s6, %s838_s6, %s839_s26  }
  0x1e   : > { %798 = dma.done.wait (%p944_p12), [#allocation3], 6144  }
  0x1f   : > { %800 = vsyncadd (%p944_p12), [#allocation3], 4294961152  ;;  %s965_s30 = sshll.u32 %s819_s21, 1  ;;  %p261_p1 = scmp.lt.s32.totalorder %s823_s22, 1  ;;  %vm287_vm0 = vcmask 1043456   ;;  %v274_v1 = vld [vmem:[%s1042_s1 + $0x8] sm:$0xff] }
  0x20   : > { %p263_p2 = scmp.lt.s32.totalorder %s965_s30, 3  ;;  %v275_v0 = vld [vmem:[%s1042_s1 + $0x10] sm:$0xf]  ;;  %v335_v2 = vld [vmem:[#allocation2 + $0x78] sm:$0xff]  ;;  %v273_v3 = vld [vmem:[%s1042_s1] sm:$0xff]  ;;  %vm280_vm1 = vcmask 162816  }
  0x21   : > { %s262_s9 = scalar_select %p261_p1, %s823_s22, 1  ;;  %590 = vmatpush.msk.msra.mxu0 %vm287_vm0, %v275_v0  ;;  %601 = vmatpush.msra.mxu1 %v335_v2  ;;  %v334_v5 = vld [vmem:[#allocation2 + $0x70] sm:$0xff]  ;;  %v333_v6 = vld [vmem:[#allocation2 + $0x68] sm:$0xff]  ;;  %v332_v7 = vld [vmem:[#allocation2 + $0x60] sm:$0xff] }
  0x22   : > { %s264_s10 = scalar_select %p263_p2, %s965_s30, 3  ;;  %v331_v8 = vld [vmem:[#allocation2 + $0x58] sm:$0xff]  ;;  %v330_v10 = vld [vmem:[#allocation2 + $0x50] sm:$0xff]  ;;  %v329_v11 = vld [vmem:[#allocation2 + $0x48] sm:$0xff] }
  0x23   : > { %s588_s13 = sshll.u32 %s262_s9, 2  ;;  %305 = vmatpush.msra.mxu0 %v274_v1  ;;  %602 = vmatpush.msra.mxu1 %v334_v5  ;;  %v328_v12 = vld [vmem:[#allocation2 + $0x40] sm:$0xff]  ;;  %v327_v13 = vld [vmem:[#allocation2 + $0x38] sm:$0xff]  ;;  %v326_v14 = vld [vmem:[#allocation2 + $0x30] sm:$0xff]  ;;  %s257_s15 = sand.u32 1, %s811_s19  }
  0x24   : > { %s266_s11 = sadd.s32 %s588_s13, %s264_s10  ;;  %v325_v15 = vld [vmem:[#allocation2 + $0x28] sm:$0xff]  ;;  %v324_v16 = vld [vmem:[#allocation2 + $0x20] sm:$0xff]  ;;  %v323_v17 = vld [vmem:[#allocation2 + $0x18] sm:$0xff]  ;;  %s586_s12 = sshll.u32 %s257_s15, 4 }
  0x25   : > { %s589_s14 = sshll.u32 %s266_s11, 3  ;;  %306 = vmatpush.msra.mxu0 %v273_v3  ;;  %603 = vmatpush.msra.mxu1 %v333_v6  ;;  %v322_v18 = vld [vmem:[#allocation2 + $0x10] sm:$0xff]  ;;  %v321_v19 = vld [vmem:[#allocation2 + $0x8] sm:$0xff]  ;;  %v320_v20 = vld [vmem:[#allocation2] sm:$0xff]  ;;  %s259_s9 = scalar_lea.vmem [#allocation5], %s586_s12 }
  0x26   : > { %s268_s26 = scalar_lea.vmem %s1041_s0, %s589_s14  ;;  %v385_v21 = vld [vmem:[#allocation2 + $0xf8] sm:$0xff]  ;;  %v384_v22 = vld [vmem:[#allocation2 + $0xf0] sm:$0xff]  ;;  %v383_v23 = vld [vmem:[#allocation2 + $0xe8] sm:$0xff]  ;;  %s597_s14 = sshll.u32 %s823_s22, 2 }
  0x27   : > { %v271_v4 = vld [vmem:[%s268_s26] sm:$0xff]  ;;  %340 = vmatpush.msrb.mxu0 %v335_v2  ;;  %604 = vmatpush.msra.mxu1 %v332_v7  ;;  %v272_v9 = vld [vmem:[%s268_s26 + $0x8] sm:$0xff]  ;;  %v381_v25 = vld [vmem:[#allocation2 + $0xd8] sm:$0xff]  ;;  %s479_s17 = sadd.s32 %s597_s14, %s965_s30  ;;  %s482_s13 = sshll.u32 %s259_s9, 4  ;;  %s483_s13 = int_to_ptr.vmem [resolvable:$true] %s482_s13 }
  0x28   : > { %591 = vmatmul.msk.f32.vlgmr.msra.gmra.mxu0 %vm280_vm1, %v271_v4  ;;  %391 = vmatpush.msra.mxu2 %v385_v21  ;;  %v382_v24 = vld [vmem:[#allocation2 + $0xe0] sm:$0xff]  ;;  %v380_v26 = vld [vmem:[#allocation2 + $0xd0] sm:$0xff]  ;;  %v379_v27 = vld [vmem:[#allocation2 + $0xc8] sm:$0xff]  ;;  %s598_s6 = sshll.u32 %s479_s17, 3  ;;  %s468_s22 = scalar_lea.sflag [#allocation4], %s257_s15 }
  0x29   : > { %341 = vmatpush.msrb.mxu0 %v334_v5  ;;  %605 = vmatpush.msra.mxu1 %v331_v8  ;;  %v378_v28 = vld [vmem:[#allocation2 + $0xc0] sm:$0xff]  ;;  %v377_v29 = vld [vmem:[#allocation2 + $0xb8] sm:$0xff]  ;;  %v376_v31 = vld [vmem:[#allocation2 + $0xb0] sm:$0xff]  ;;  %s481_s29 = scalar_lea.hbm %s1046_s5, %s598_s6  ;;  %s757_s12 = scalar_lea.hbm %s1046_s5, 64 }
  0x2a   : > { %392 = vmatpush.msra.mxu2 %v384_v22  ;;  %v703_v30 = vld [vmem:[%s1043_s2] ss:$0 sm:$0xff]  ;;  %v375_v33 = vld [vmem:[#allocation2 + $0xa8] sm:$0xff]  ;;  %v373_v37 = vld [vmem:[#allocation2 + $0x98] sm:$0xff]  ;;  %s484_s10 = sshll.u32 %s481_s29, 4  ;;  %s485_s10 = int_to_ptr.hbm [resolvable:$true] %s484_s10 }
  0x2b   : > { %342 = vmatpush.msrb.mxu0 %v333_v6  ;;  %606 = vmatpush.msra.mxu1 %v330_v10  ;;  %v374_v35 = vld [vmem:[#allocation2 + $0xa0] sm:$0xff]  ;;  %v372_v43 = vld [vmem:[#allocation2 + $0x90] sm:$0xff]  ;;  %v371_v44 = vld [vmem:[#allocation2 + $0x88] sm:$0xff]  ;;  %s751_s30 = sshra.s32 %s485_s10, 4  ;;  %s752_s30 = int_to_ptr.hbm [resolvable:$true] %s751_s30 }
  0x2c   : > { %393 = vmatpush.msra.mxu2 %v383_v23  ;;  %v370_v45 = vld [vmem:[#allocation2 + $0x80] sm:$0xff]  ;;  %v436_v46 = vld [vmem:[#allocation2 + $0x178] sm:$0xff]  ;;  %v435_v47 = vld [vmem:[#allocation2 + $0x170] sm:$0xff]  ;;  %s753_s11 = scalar_lea.hbm %s752_s30, 16  ;;  %p758_p7 = scmp.lt.s32.totalorder %s752_s30, %s1046_s5 }
  0x2d   : > { %343 = vmatpush.msrb.mxu0 %v332_v7  ;;  %607 = vmatpush.msra.mxu1 %v329_v11  ;;  %v434_v48 = vld [vmem:[#allocation2 + $0x168] sm:$0xff]  ;;  %v433_v49 = vld [vmem:[#allocation2 + $0x160] sm:$0xff]  ;;  %v432_v50 = vld [vmem:[#allocation2 + $0x158] sm:$0xff]  ;;  %p754_p4 = scmp.ne.s32.totalorder %s752_s30, %s753_s11  ;;  %p759_p9 = scmp.lt.s32.totalorder %s757_s12, %s753_s11 }
  0x2e   : > { %394 = vmatpush.msra.mxu2 %v382_v24  ;;  %442 = vmatpush.msra.mxu3 %v436_v46  ;;  %v431_v51 = vld [vmem:[#allocation2 + $0x150] sm:$0xff]  ;;  %v430_v52 = vld [vmem:[#allocation2 + $0x148] sm:$0xff]  ;;  %v429_v53 = vld [vmem:[#allocation2 + $0x140] sm:$0xff] }
  0x2f   : > { %344 = vmatpush.msrb.mxu0 %v331_v8  ;;  %608 = vmatpush.msra.mxu1 %v328_v12  ;;  %v428_v54 = vld [vmem:[#allocation2 + $0x138] sm:$0xff]  ;;  %v704_v55 = vld [vmem:[%s1045_s4] ss:$0 sm:$0xff]  ;;  %v427_v56 = vld [vmem:[#allocation2 + $0x130] sm:$0xff]  ;;  %p755_p5 = pnand %p754_p4, %p924_p3  ;;  %p760_p10 = por %p759_p9, %p758_p7 }
  0x30   : > { %592 = vmatmul.msk.f32.gmra.mxu0 %vm280_vm1, %v272_v9  ;;  %395 = vmatpush.msra.mxu2 %v381_v25  ;;  %v426_v58 = vld [vmem:[#allocation2 + $0x128] sm:$0xff]  ;;  %v425_v60 = vld [vmem:[#allocation2 + $0x120] sm:$0xff]  ;;  %v424_v62 = vld [vmem:[#allocation2 + $0x118] sm:$0xff] }
  0x31   : > { %345 = vmatpush.msrb.mxu0 %v330_v10  ;;  %609 = vmatpush.msra.mxu1 %v327_v13  ;;  %v423_v4 = vld [vmem:[#allocation2 + $0x110] sm:$0xff]  ;;  %v422_v5 = vld [vmem:[#allocation2 + $0x108] sm:$0xff]  ;;  %v421_v6 = vld [vmem:[#allocation2 + $0x100] sm:$0xff]  ;;  %p756_p6 = pneg %p755_p5 }
  0x32   : > { %396 = vmatpush.msra.mxu2 %v380_v26  ;;  %443 = vmatpush.msra.mxu3 %v435_v47  ;;  %v705_v7 = vld [vmem:[%s1045_s4 + $0x1] ss:$0 sm:$0xff] }
  0x33   : > { %346 = vmatpush.msrb.mxu0 %v329_v11  ;;  %610 = vmatpush.msra.mxu1 %v326_v14  ;;  %p761_p11 = pnand %p760_p10, %p756_p6 }
  0x34   : > { %397 = vmatpush.msra.mxu2 %v379_v27  ;;  %444 = vmatpush.msra.mxu3 %v434_v48 }
  0x35   : > { %347 = vmatpush.msrb.mxu0 %v328_v12  ;;  %611 = vmatpush.msra.mxu1 %v325_v15 }
  0x36   : > { %398 = vmatpush.msra.mxu2 %v378_v28  ;;  %445 = vmatpush.msra.mxu3 %v433_v49 }
  0x37   : > { %348 = vmatpush.msrb.mxu0 %v327_v13  ;;  %612 = vmatpush.msra.mxu1 %v324_v16 }
  0x38   : > { %399 = vmatpush.msra.mxu2 %v377_v29  ;;  %446 = vmatpush.msra.mxu3 %v432_v50 }
  0x39   : > { %349 = vmatpush.msrb.mxu0 %v326_v14  ;;  %613 = vmatpush.msra.mxu1 %v323_v17 }
  0x3a   : > { %400 = vmatpush.msra.mxu2 %v376_v31  ;;  %447 = vmatpush.msra.mxu3 %v431_v51 }
  0x3b   : > { %350 = vmatpush.msrb.mxu0 %v325_v15  ;;  %614 = vmatpush.msra.mxu1 %v322_v18 }
  0x3c   : > { %401 = vmatpush.msra.mxu2 %v375_v33  ;;  %448 = vmatpush.msra.mxu3 %v430_v52 }
  0x3d   : > { %351 = vmatpush.msrb.mxu0 %v324_v16  ;;  %615 = vmatpush.msra.mxu1 %v321_v19  ;;  %v706_v16 = vld [vmem:[%s1045_s4 + $0x2] ss:$0 sm:$0xff] }
  0x3e   : > { %402 = vmatpush.msra.mxu2 %v374_v35  ;;  %449 = vmatpush.msra.mxu3 %v429_v53 }
  0x3f   : > { %352 = vmatpush.msrb.mxu0 %v323_v17  ;;  %616 = vmatpush.msra.mxu1 %v320_v20 }
  0x40   : > { %403 = vmatpush.msra.mxu2 %v373_v37  ;;  %450 = vmatpush.msra.mxu3 %v428_v54 }
  0x41   : > { %353 = vmatpush.msrb.mxu0 %v322_v18 }
  0x42   : > { %404 = vmatpush.msra.mxu2 %v372_v43  ;;  %451 = vmatpush.msra.mxu3 %v427_v56 }
  0x43   : > { %354 = vmatpush.msrb.mxu0 %v321_v19 }
  0x44   : > { %405 = vmatpush.msra.mxu2 %v371_v44  ;;  %452 = vmatpush.msra.mxu3 %v426_v58 }
  0x45   : > { %355 = vmatpush.msrb.mxu0 %v320_v20 }
  0x46   : > { %406 = vmatpush.msra.mxu2 %v370_v45  ;;  %453 = vmatpush.msra.mxu3 %v425_v60 }
  0x48   : > { %454 = vmatpush.msra.mxu3 %v424_v62 }
  0x4a   : > { %455 = vmatpush.msra.mxu3 %v423_v4 }
  0x4c   : > { %456 = vmatpush.msra.mxu3 %v422_v5 }
  0x4e   : > { %457 = vmatpush.msra.mxu3 %v421_v6 }
  0xa5   : > { %v308_v32 = vpop.f32.mrf.mxu0 }
  0xa6   : > { %v309_v34 = vadd.f32 %v703_v30, %v308_v32 }
  0xa8   : > { %v316_v36 = vmul.f32 0.01, %v309_v34  ;;  %vm314_vm2 = vcmp.gt.f32.partialorder %v309_v34, 0.0 }
  0xaa   : > { %v318_v38 = vsel %vm314_vm2, %v309_v34, %v316_v36 }
  0xab   : > { %356 = vmatmul.f32.vlgmr.msrb.gmra.mxu0 %v318_v38 }
  0xad   : > { %v311_v39 = vpop.f32.mrf.mxu0 }
  0xae   : > { %v312_v40 = vadd.f32 %v703_v30, %v311_v39 }
  0xb0   : > { %vm315_vm3 = vcmp.gt.f32.partialorder %v312_v40, 0.0  ;;  %v317_v41 = vmul.f32 0.01, %v312_v40 }
  0xb2   : > { %v319_v42 = vsel %vm315_vm3, %v312_v40, %v317_v41 }
  0xb3   : > { %359 = vmatmul.f32.vlgmr.msra.gmra.mxu1 %v319_v42 }
 0x128   : > { %v357_v57 = vpop.f32.mrf.mxu0 }
 0x129   : > { %v358_v59 = vadd.f32 %v704_v55, %v357_v57 }
 0x12b   : > { %vm363_vm4 = vcmp.gt.f32.partialorder %v358_v59, 0.0  ;;  %v365_v61 = vmul.f32 0.01, %v358_v59 }
 0x12d   : > { %v367_v63 = vsel %vm363_vm4, %v358_v59, %v365_v61 }
 0x12e   : > { %407 = vmatmul.f32.vlgmr.msra.gmra.mxu2 %v367_v63 }
 0x130   : > { %v360_v0 = vpop.f32.mrf.mxu1 }
 0x131   : > { %v361_v1 = vadd.f32 %v704_v55, %v360_v0 }
 0x133   : > { %vm364_vm5 = vcmp.gt.f32.partialorder %v361_v1, 0.0  ;;  %v366_v2 = vmul.f32 0.01, %v361_v1 }
 0x135   : > { %v368_v3 = vsel %vm364_vm5, %v361_v1, %v366_v2 }
 0x136   : > { %410 = vmatmul.f32.gmra.mxu2 %v368_v3 }
 0x1b1   : > { %v408_v8 = vpop.f32.mrf.mxu2 }
 0x1b2   : > { %v409_v9 = vadd.f32 %v705_v7, %v408_v8 }
 0x1b4   : > { %vm414_vm6 = vcmp.gt.f32.partialorder %v409_v9, 0.0  ;;  %v416_v10 = vmul.f32 0.01, %v409_v9 }
 0x1b6   : > { %v418_v11 = vsel %vm414_vm6, %v409_v9, %v416_v10 }
 0x1b7   : > { %458 = vmatmul.f32.vlgmr.msra.gmra.mxu3 %v418_v11 }
 0x1b9   : > { %v411_v12 = vpop.f32.mrf.mxu2 }
 0x1ba   : > { %v412_v13 = vadd.f32 %v705_v7, %v411_v12 }
 0x1bc   : > { %vm415_vm7 = vcmp.gt.f32.partialorder %v412_v13, 0.0  ;;  %v417_v14 = vmul.f32 0.01, %v412_v13 }
 0x1be   : > { %v419_v15 = vsel %vm415_vm7, %v412_v13, %v417_v14 }
 0x1bf   : > { %461 = vmatmul.f32.gmra.mxu3 %v419_v15 }
 0x23a   : > { %v459_v17 = vpop.f32.mrf.mxu3 }
 0x23b   : > { %v460_v18 = vadd.f32 %v706_v16, %v459_v17 }
 0x23d   : > { %465 = vst [vmem:[%s259_s9] sm:$0xff] %v460_v18 }
 0x242   : > { %v462_v19 = vpop.f32.mrf.mxu3 }
 0x243   : > { %v463_v20 = vadd.f32 %v706_v16, %v462_v19 }
 0x245   : > { %466 = vst [vmem:[%s259_s9 + $0x8] sm:$0xff] %v463_v20 }
 0x246   : > { %764 = shalt.err (!%p761_p11)
}
 0x247   : > { %s840_s15 = smov 128   ;;  %s841_s6 = smov 8  }
 0x248   : > { %621 = dma.vmem_to_hbm [thread:$0]  (%p924_p3), %s483_s13, 256, %s485_s10, %s468_s22, %s840_s15, %s840_s15, %s841_s6  }
 0x249 PF: > { %p633_p12 = scmp.ge.s32.totalorder %s835_s25, 2  ;;  %s499_s26 = sand.u32 1, %s807_s18  }
 0x24a   : > { %s500_s3 = scalar_lea.sflag [#allocation4], %s499_s26 }
 0x24b   : > { %p628_p13 = pnand %p633_p12, %p933_p8 }
 0x24d   : > { %p629_p0 = pneg %p628_p13 }
 0x24f   : > { %802 = dma.done.wait (%p629_p0), %s500_s3, 256  }
 0x250   : > { %804 = vsyncadd (%p629_p0), %s500_s3, 4294967040  ;;  %s19_s25 = sadd.s32 1, %s835_s25   ;;  %s1055_s7 = sld [smem:[#allocation8_spill]] }
 0x251   : > { %p16_p1 = scmp.ge.s32.totalorder %s19_s25, 6   ;;  %s1056_s18 = smov %s811_s19 }
 0x252   : > { %s1057_s19 = smov %s815_s20  ;;  %s1058_s20 = smov %s954_s16 }
 0x253   : > { %s1059_s21 = smov %s827_s23  ;;  %s1060_s22 = smov %s831_s24 }
 0x254   : > { %s1061_s23 = smov %s1064_s28  ;;  %18 = sbr.rel (!%p16_p1) target bundleno = 8 (0x8), region = 84 }
 0x256   : > { %s1062_s24 = smov %s1055_s7 }
 0x259   :  { %506 = vsyncpa [#allocation3], 1 }
 0x25a   :  { %508 = vsyncpa [#allocation3 + $0x1], 1 }
 0x25b   :  { %509 = vsyncpa [#allocation4], 1 }
 0x25c   :  { %511 = vsyncpa [#allocation4 + $0x1], 1 }

// kernel: tpu_custom_call.1
= control target key start
LH: loop header
LB: loop body
LE: loop exit
PB: predicated region body
PF: predicated region fallthrough
CT: control target
= control target key end

     0   :  { %s1041_s0 = inlined_call_operand.vmem [shape: f32[2,32,20], index: 0, kind: input, shape index: {}]   ;;  %s1042_s1 = inlined_call_operand.vmem [shape: f32[20,128], index: 1, kind: input, shape index: {}]   ;;  %s1043_s2 = inlined_call_operand.vmem [shape: f32[1,128], index: 2, kind: input, shape index: {}]   ;;  %s1044_s3 = inlined_call_operand.hbm [shape: f32[3,128,128], index: 3, kind: input, shape index: {}]   ;;  %s1045_s4 = inlined_call_operand.vmem [shape: f32[3,1,128], index: 4, kind: input, shape index: {}]   ;;  %s1046_s5 = inlined_call_operand.hbm [shape: f32[2,32,128], index: 5, kind: output, shape index: {}]  }
   0x1   :  { %1048 = sst [smem:[#allocation9_spill]] %s1044_s3 }
   0x2   :  { %10 = vsyncpa [#allocation3], 0 }
   0x3   :  { %11 = vsyncpa [#allocation4], 0 }
   0x4   :  { %13 = vsyncpa [#allocation4 + $0x1], 0  ;;  %s872_s18 = smov 0   ;;  %s874_s19 = smov 0  }
   0x5   :  { %s876_s20 = smov 0   ;;  %s878_s21 = smov 0  }
   0x6   :  { %s880_s22 = smov 0   ;;  %s882_s23 = smov 0  }
   0x7   :  { %s884_s24 = smov 0   ;;  %s886_s25 = smov 0  }
   0x8 LB: > { %s579_s26 = sadd.s32 4294967295, %s835_s25   ;;  %s580_s27 = sadd.s32 4294967294, %s835_s25   ;;  %s835_s25 = sphi %s886_s25, %s19_s25   ;;  %s831_s24 = sphi %s884_s24, %s1062_s24   ;;  %s827_s23 = sphi %s882_s23, %s1061_s23   ;;  %s823_s22 = sphi %s880_s22, %s1060_s22   ;;  %s819_s21 = sphi %s878_s21, %s1059_s21   ;;  %s815_s20 = sphi %s876_s20, %s1058_s20   ;;  %s811_s19 = sphi %s874_s19, %s1057_s19   ;;  %s807_s18 = sphi %s872_s18, %s1056_s18  }
   0x9   : > { %s28_s28 = sadd.s32 1, %s827_s23  ;;  %s31_s29 = sadd.s32 1, %s831_s24 }
   0xa   : > { %p29_p0 = scmp.ge.s32.totalorder %s28_s28, 2  ;;  %s152_s30 = sadd.s32 1, %s815_s20 }
   0xb   : > { %p162_p1 = scmp.ne.s32.totalorder %s815_s20, %s811_s19  ;;  %p163_p2 = scmp.eq.s32.totalorder %s579_s26, 3 }
   0xc   : > { %s1064_s28 = smov (%p29_p0, %s28_s28), 0  ;;  %s1066_s29 = smov (!%p29_p0, %s31_s29), %s831_s24 }
   0xd   : > { %s148_s6 = ssub.s32 %s827_s23, %s1064_s28  ;;  %p924_p3 = por %p163_p2, %p162_p1 }
   0xe   : > { %p33_p4 = scmp.ge.s32.totalorder %s1066_s29, 2  ;;  %p168_p5 = scmp.ne.s32.totalorder %s811_s19, %s807_s18 }
   0xf   : > { %p169_p6 = scmp.eq.s32.totalorder %s580_s27, 3  ;;  %p581_p7 = scmp.ge.s32.totalorder %s835_s25, 1 }
  0x10   : > { %s1068_s29 = smov (%p33_p4, %s1066_s29), 0  ;;  %p176_p9 = scmp.lt.s32.totalorder %s835_s25, 5 }
  0x11   : > { %1050 = sst [smem:[#allocation8_spill]] %s1068_s29  ;;  %p933_p8 = por %p169_p6, %p168_p5 }
  0x12   : > { %s147_s9 = ssub.s32 %s831_s24, %s1068_s29  ;;  %p940_p10 = pnand %p581_p7, %p176_p9 }
  0x13   : > { %s149_s10 = sor.u32 %s148_s6, %s147_s9  ;;  %p944_p12 = scmp.eq.s32.totalorder %s579_s26, 0 }
  0x14   : > { %p150_p11 = scmp.eq.s32.totalorder %s149_s10, 0  ;;  %p623_p13 = pneg %p940_p10 }
  0x15   : > { %s1054_s3 = sld [smem:[#allocation9_spill]]  ;;  %s837_s17 = smov [#allocation2]  }
  0x16   : > { %s954_s16 = scalar_select %p150_p11, %s815_s20, %s152_s30  }
  0x17   : > { %s195_s27 = sshll.u32 %s837_s17, 4  ;;  %p624_p0 = pnand %p944_p12, %p623_p13  ;;  %s196_s27 = int_to_ptr.vmem [resolvable:$true] %s195_s27 }
  0x18   : > { %s838_s6 = smov 128   ;;  %s839_s26 = smov 8  }
  0x19   : > { %227 = sbr.rel (%p940_p10) target bundleno = 585 (0x249), region = 40 }
  0x1b   : > { %s193_s15 = sshll.u32 %s1054_s3, 4  ;;  %s194_s15 = int_to_ptr.hbm [resolvable:$true] %s193_s15 }
  0x1c   : > { %626 = dma.hbm_to_vmem [thread:$0]  (!%p624_p0), %s194_s15, 6144, %s196_s27, [#allocation3], %s838_s6, %s838_s6, %s839_s26  }
  0x1e   : > { %798 = dma.done.wait (%p944_p12), [#allocation3], 6144  }
  0x1f   : > { %800 = vsyncadd (%p944_p12), [#allocation3], 4294961152  ;;  %s965_s30 = sshll.u32 %s819_s21, 1  ;;  %p261_p1 = scmp.lt.s32.totalorder %s823_s22, 1  ;;  %vm287_vm0 = vcmask 1043456   ;;  %v274_v1 = vld [vmem:[%s1042_s1 + $0x8] sm:$0xff] }
  0x20   : > { %p263_p2 = scmp.lt.s32.totalorder %s965_s30, 3  ;;  %v275_v0 = vld [vmem:[%s1042_s1 + $0x10] sm:$0xf]  ;;  %v335_v2 = vld [vmem:[#allocation2 + $0x78] sm:$0xff]  ;;  %v273_v3 = vld [vmem:[%s1042_s1] sm:$0xff]  ;;  %vm280_vm1 = vcmask 162816  }
  0x21   : > { %s262_s9 = scalar_select %p261_p1, %s823_s22, 1  ;;  %590 = vmatpush.msk.msra.mxu0 %vm287_vm0, %v275_v0  ;;  %601 = vmatpush.msra.mxu1 %v335_v2  ;;  %v334_v5 = vld [vmem:[#allocation2 + $0x70] sm:$0xff]  ;;  %v333_v6 = vld [vmem:[#allocation2 + $0x68] sm:$0xff]  ;;  %v332_v7 = vld [vmem:[#allocation2 + $0x60] sm:$0xff] }
  0x22   : > { %s264_s10 = scalar_select %p263_p2, %s965_s30, 3  ;;  %v331_v8 = vld [vmem:[#allocation2 + $0x58] sm:$0xff]  ;;  %v330_v10 = vld [vmem:[#allocation2 + $0x50] sm:$0xff]  ;;  %v329_v11 = vld [vmem:[#allocation2 + $0x48] sm:$0xff] }
  0x23   : > { %s588_s13 = sshll.u32 %s262_s9, 2  ;;  %305 = vmatpush.msra.mxu0 %v274_v1  ;;  %602 = vmatpush.msra.mxu1 %v334_v5  ;;  %v328_v12 = vld [vmem:[#allocation2 + $0x40] sm:$0xff]  ;;  %v327_v13 = vld [vmem:[#allocation2 + $0x38] sm:$0xff]  ;;  %v326_v14 = vld [vmem:[#allocation2 + $0x30] sm:$0xff]  ;;  %s257_s15 = sand.u32 1, %s811_s19  }
  0x24   : > { %s266_s11 = sadd.s32 %s588_s13, %s264_s10  ;;  %v325_v15 = vld [vmem:[#allocation2 + $0x28] sm:$0xff]  ;;  %v324_v16 = vld [vmem:[#allocation2 + $0x20] sm:$0xff]  ;;  %v323_v17 = vld [vmem:[#allocation2 + $0x18] sm:$0xff]  ;;  %s586_s12 = sshll.u32 %s257_s15, 4 }
  0x25   : > { %s589_s14 = sshll.u32 %s266_s11, 3  ;;  %306 = vmatpush.msra.mxu0 %v273_v3  ;;  %603 = vmatpush.msra.mxu1 %v333_v6  ;;  %v322_v18 = vld [vmem:[#allocation2 + $0x10] sm:$0xff]  ;;  %v321_v19 = vld [vmem:[#allocation2 + $0x8] sm:$0xff]  ;;  %v320_v20 = vld [vmem:[#allocation2] sm:$0xff]  ;;  %s259_s9 = scalar_lea.vmem [#allocation5], %s586_s12 }
  0x26   : > { %s268_s26 = scalar_lea.vmem %s1041_s0, %s589_s14  ;;  %v385_v21 = vld [vmem:[#allocation2 + $0xf8] sm:$0xff]  ;;  %v384_v22 = vld [vmem:[#allocation2 + $0xf0] sm:$0xff]  ;;  %v383_v23 = vld [vmem:[#allocation2 + $0xe8] sm:$0xff]  ;;  %s597_s14 = sshll.u32 %s823_s22, 2 }
  0x27   : > { %v271_v4 = vld [vmem:[%s268_s26] sm:$0xff]  ;;  %340 = vmatpush.msrb.mxu0 %v335_v2  ;;  %604 = vmatpush.msra.mxu1 %v332_v7  ;;  %v272_v9 = vld [vmem:[%s268_s26 + $0x8] sm:$0xff]  ;;  %v381_v25 = vld [vmem:[#allocation2 + $0xd8] sm:$0xff]  ;;  %s479_s17 = sadd.s32 %s597_s14, %s965_s30  ;;  %s482_s13 = sshll.u32 %s259_s9, 4  ;;  %s483_s13 = int_to_ptr.vmem [resolvable:$true] %s482_s13 }
  0x28   : > { %591 = vmatmul.msk.f32.vlgmr.msra.gmra.mxu0 %vm280_vm1, %v271_v4  ;;  %391 = vmatpush.msra.mxu2 %v385_v21  ;;  %v382_v24 = vld [vmem:[#allocation2 + $0xe0] sm:$0xff]  ;;  %v380_v26 = vld [vmem:[#allocation2 + $0xd0] sm:$0xff]  ;;  %v379_v27 = vld [vmem:[#allocation2 + $0xc8] sm:$0xff]  ;;  %s598_s6 = sshll.u32 %s479_s17, 3  ;;  %s468_s22 = scalar_lea.sflag [#allocation4], %s257_s15 }
  0x29   : > { %341 = vmatpush.msrb.mxu0 %v334_v5  ;;  %605 = vmatpush.msra.mxu1 %v331_v8  ;;  %v378_v28 = vld [vmem:[#allocation2 + $0xc0] sm:$0xff]  ;;  %v377_v29 = vld [vmem:[#allocation2 + $0xb8] sm:$0xff]  ;;  %v376_v31 = vld [vmem:[#allocation2 + $0xb0] sm:$0xff]  ;;  %s481_s29 = scalar_lea.hbm %s1046_s5, %s598_s6  ;;  %s757_s12 = scalar_lea.hbm %s1046_s5, 64 }
  0x2a   : > { %392 = vmatpush.msra.mxu2 %v384_v22  ;;  %v703_v30 = vld [vmem:[%s1043_s2] ss:$0 sm:$0xff]  ;;  %v375_v33 = vld [vmem:[#allocation2 + $0xa8] sm:$0xff]  ;;  %v373_v37 = vld [vmem:[#allocation2 + $0x98] sm:$0xff]  ;;  %s484_s10 = sshll.u32 %s481_s29, 4  ;;  %s485_s10 = int_to_ptr.hbm [resolvable:$true] %s484_s10 }
  0x2b   : > { %342 = vmatpush.msrb.mxu0 %v333_v6  ;;  %606 = vmatpush.msra.mxu1 %v330_v10  ;;  %v374_v35 = vld [vmem:[#allocation2 + $0xa0] sm:$0xff]  ;;  %v372_v43 = vld [vmem:[#allocation2 + $0x90] sm:$0xff]  ;;  %v371_v44 = vld [vmem:[#allocation2 + $0x88] sm:$0xff]  ;;  %s751_s30 = sshra.s32 %s485_s10, 4  ;;  %s752_s30 = int_to_ptr.hbm [resolvable:$true] %s751_s30 }
  0x2c   : > { %393 = vmatpush.msra.mxu2 %v383_v23  ;;  %v370_v45 = vld [vmem:[#allocation2 + $0x80] sm:$0xff]  ;;  %v436_v46 = vld [vmem:[#allocation2 + $0x178] sm:$0xff]  ;;  %v435_v47 = vld [vmem:[#allocation2 + $0x170] sm:$0xff]  ;;  %s753_s11 = scalar_lea.hbm %s752_s30, 16  ;;  %p758_p7 = scmp.lt.s32.totalorder %s752_s30, %s1046_s5 }
  0x2d   : > { %343 = vmatpush.msrb.mxu0 %v332_v7  ;;  %607 = vmatpush.msra.mxu1 %v329_v11  ;;  %v434_v48 = vld [vmem:[#allocation2 + $0x168] sm:$0xff]  ;;  %v433_v49 = vld [vmem:[#allocation2 + $0x160] sm:$0xff]  ;;  %v432_v50 = vld [vmem:[#allocation2 + $0x158] sm:$0xff]  ;;  %p754_p4 = scmp.ne.s32.totalorder %s752_s30, %s753_s11  ;;  %p759_p9 = scmp.lt.s32.totalorder %s757_s12, %s753_s11 }
  0x2e   : > { %394 = vmatpush.msra.mxu2 %v382_v24  ;;  %442 = vmatpush.msra.mxu3 %v436_v46  ;;  %v431_v51 = vld [vmem:[#allocation2 + $0x150] sm:$0xff]  ;;  %v430_v52 = vld [vmem:[#allocation2 + $0x148] sm:$0xff]  ;;  %v429_v53 = vld [vmem:[#allocation2 + $0x140] sm:$0xff] }
  0x2f   : > { %344 = vmatpush.msrb.mxu0 %v331_v8  ;;  %608 = vmatpush.msra.mxu1 %v328_v12  ;;  %v428_v54 = vld [vmem:[#allocation2 + $0x138] sm:$0xff]  ;;  %v704_v55 = vld [vmem:[%s1045_s4] ss:$0 sm:$0xff]  ;;  %v427_v56 = vld [vmem:[#allocation2 + $0x130] sm:$0xff]  ;;  %p755_p5 = pnand %p754_p4, %p924_p3  ;;  %p760_p10 = por %p759_p9, %p758_p7 }
  0x30   : > { %592 = vmatmul.msk.f32.gmra.mxu0 %vm280_vm1, %v272_v9  ;;  %395 = vmatpush.msra.mxu2 %v381_v25  ;;  %v426_v58 = vld [vmem:[#allocation2 + $0x128] sm:$0xff]  ;;  %v425_v60 = vld [vmem:[#allocation2 + $0x120] sm:$0xff]  ;;  %v424_v62 = vld [vmem:[#allocation2 + $0x118] sm:$0xff] }
  0x31   : > { %345 = vmatpush.msrb.mxu0 %v330_v10  ;;  %609 = vmatpush.msra.mxu1 %v327_v13  ;;  %v423_v4 = vld [vmem:[#allocation2 + $0x110] sm:$0xff]  ;;  %v422_v5 = vld [vmem:[#allocation2 + $0x108] sm:$0xff]  ;;  %v421_v6 = vld [vmem:[#allocation2 + $0x100] sm:$0xff]  ;;  %p756_p6 = pneg %p755_p5 }
  0x32   : > { %396 = vmatpush.msra.mxu2 %v380_v26  ;;  %443 = vmatpush.msra.mxu3 %v435_v47  ;;  %v705_v7 = vld [vmem:[%s1045_s4 + $0x1] ss:$0 sm:$0xff] }
  0x33   : > { %346 = vmatpush.msrb.mxu0 %v329_v11  ;;  %610 = vmatpush.msra.mxu1 %v326_v14  ;;  %p761_p11 = pnand %p760_p10, %p756_p6 }
  0x34   : > { %397 = vmatpush.msra.mxu2 %v379_v27  ;;  %444 = vmatpush.msra.mxu3 %v434_v48 }
  0x35   : > { %347 = vmatpush.msrb.mxu0 %v328_v12  ;;  %611 = vmatpush.msra.mxu1 %v325_v15 }
  0x36   : > { %398 = vmatpush.msra.mxu2 %v378_v28  ;;  %445 = vmatpush.msra.mxu3 %v433_v49 }
  0x37   : > { %348 = vmatpush.msrb.mxu0 %v327_v13  ;;  %612 = vmatpush.msra.mxu1 %v324_v16 }
  0x38   : > { %399 = vmatpush.msra.mxu2 %v377_v29  ;;  %446 = vmatpush.msra.mxu3 %v432_v50 }
  0x39   : > { %349 = vmatpush.msrb.mxu0 %v326_v14  ;;  %613 = vmatpush.msra.mxu1 %v323_v17 }
  0x3a   : > { %400 = vmatpush.msra.mxu2 %v376_v31  ;;  %447 = vmatpush.msra.mxu3 %v431_v51 }
  0x3b   : > { %350 = vmatpush.msrb.mxu0 %v325_v15  ;;  %614 = vmatpush.msra.mxu1 %v322_v18 }
  0x3c   : > { %401 = vmatpush.msra.mxu2 %v375_v33  ;;  %448 = vmatpush.msra.mxu3 %v430_v52 }
  0x3d   : > { %351 = vmatpush.msrb.mxu0 %v324_v16  ;;  %615 = vmatpush.msra.mxu1 %v321_v19  ;;  %v706_v16 = vld [vmem:[%s1045_s4 + $0x2] ss:$0 sm:$0xff] }
  0x3e   : > { %402 = vmatpush.msra.mxu2 %v374_v35  ;;  %449 = vmatpush.msra.mxu3 %v429_v53 }
  0x3f   : > { %352 = vmatpush.msrb.mxu0 %v323_v17  ;;  %616 = vmatpush.msra.mxu1 %v320_v20 }
  0x40   : > { %403 = vmatpush.msra.mxu2 %v373_v37  ;;  %450 = vmatpush.msra.mxu3 %v428_v54 }
  0x41   : > { %353 = vmatpush.msrb.mxu0 %v322_v18 }
  0x42   : > { %404 = vmatpush.msra.mxu2 %v372_v43  ;;  %451 = vmatpush.msra.mxu3 %v427_v56 }
  0x43   : > { %354 = vmatpush.msrb.mxu0 %v321_v19 }
  0x44   : > { %405 = vmatpush.msra.mxu2 %v371_v44  ;;  %452 = vmatpush.msra.mxu3 %v426_v58 }
  0x45   : > { %355 = vmatpush.msrb.mxu0 %v320_v20 }
  0x46   : > { %406 = vmatpush.msra.mxu2 %v370_v45  ;;  %453 = vmatpush.msra.mxu3 %v425_v60 }
  0x48   : > { %454 = vmatpush.msra.mxu3 %v424_v62 }
  0x4a   : > { %455 = vmatpush.msra.mxu3 %v423_v4 }
  0x4c   : > { %456 = vmatpush.msra.mxu3 %v422_v5 }
  0x4e   : > { %457 = vmatpush.msra.mxu3 %v421_v6 }
  0xa5   : > { %v308_v32 = vpop.f32.mrf.mxu0 }
  0xa6   : > { %v309_v34 = vadd.f32 %v703_v30, %v308_v32 }
  0xa8   : > { %v316_v36 = vmul.f32 0.01, %v309_v34  ;;  %vm314_vm2 = vcmp.gt.f32.partialorder %v309_v34, 0.0 }
  0xaa   : > { %v318_v38 = vsel %vm314_vm2, %v309_v34, %v316_v36 }
  0xab   : > { %356 = vmatmul.f32.vlgmr.msrb.gmra.mxu0 %v318_v38 }
  0xad   : > { %v311_v39 = vpop.f32.mrf.mxu0 }
  0xae   : > { %v312_v40 = vadd.f32 %v703_v30, %v311_v39 }
  0xb0   : > { %vm315_vm3 = vcmp.gt.f32.partialorder %v312_v40, 0.0  ;;  %v317_v41 = vmul.f32 0.01, %v312_v40 }
  0xb2   : > { %v319_v42 = vsel %vm315_vm3, %v312_v40, %v317_v41 }
  0xb3   : > { %359 = vmatmul.f32.vlgmr.msra.gmra.mxu1 %v319_v42 }
 0x128   : > { %v357_v57 = vpop.f32.mrf.mxu0 }
 0x129   : > { %v358_v59 = vadd.f32 %v704_v55, %v357_v57 }
 0x12b   : > { %vm363_vm4 = vcmp.gt.f32.partialorder %v358_v59, 0.0  ;;  %v365_v61 = vmul.f32 0.01, %v358_v59 }
 0x12d   : > { %v367_v63 = vsel %vm363_vm4, %v358_v59, %v365_v61 }
 0x12e   : > { %407 = vmatmul.f32.vlgmr.msra.gmra.mxu2 %v367_v63 }
 0x130   : > { %v360_v0 = vpop.f32.mrf.mxu1 }
 0x131   : > { %v361_v1 = vadd.f32 %v704_v55, %v360_v0 }
 0x133   : > { %vm364_vm5 = vcmp.gt.f32.partialorder %v361_v1, 0.0  ;;  %v366_v2 = vmul.f32 0.01, %v361_v1 }
 0x135   : > { %v368_v3 = vsel %vm364_vm5, %v361_v1, %v366_v2 }
 0x136   : > { %410 = vmatmul.f32.gmra.mxu2 %v368_v3 }
 0x1b1   : > { %v408_v8 = vpop.f32.mrf.mxu2 }
 0x1b2   : > { %v409_v9 = vadd.f32 %v705_v7, %v408_v8 }
 0x1b4   : > { %vm414_vm6 = vcmp.gt.f32.partialorder %v409_v9, 0.0  ;;  %v416_v10 = vmul.f32 0.01, %v409_v9 }
 0x1b6   : > { %v418_v11 = vsel %vm414_vm6, %v409_v9, %v416_v10 }
 0x1b7   : > { %458 = vmatmul.f32.vlgmr.msra.gmra.mxu3 %v418_v11 }
 0x1b9   : > { %v411_v12 = vpop.f32.mrf.mxu2 }
 0x1ba   : > { %v412_v13 = vadd.f32 %v705_v7, %v411_v12 }
 0x1bc   : > { %vm415_vm7 = vcmp.gt.f32.partialorder %v412_v13, 0.0  ;;  %v417_v14 = vmul.f32 0.01, %v412_v13 }
 0x1be   : > { %v419_v15 = vsel %vm415_vm7, %v412_v13, %v417_v14 }
 0x1bf   : > { %461 = vmatmul.f32.gmra.mxu3 %v419_v15 }
 0x23a   : > { %v459_v17 = vpop.f32.mrf.mxu3 }
 0x23b   : > { %v460_v18 = vadd.f32 %v706_v16, %v459_v17 }
 0x23d   : > { %465 = vst [vmem:[%s259_s9] sm:$0xff] %v460_v18 }
 0x242   : > { %v462_v19 = vpop.f32.mrf.mxu3 }
 0x243   : > { %v463_v20 = vadd.f32 %v706_v16, %v462_v19 }
 0x245   : > { %466 = vst [vmem:[%s259_s9 + $0x8] sm:$0xff] %v463_v20 }
 0x246   : > { %764 = shalt.err (!%p761_p11)
}
 0x247   : > { %s840_s15 = smov 128   ;;  %s841_s6 = smov 8  }
 0x248   : > { %621 = dma.vmem_to_hbm [thread:$0]  (%p924_p3), %s483_s13, 256, %s485_s10, %s468_s22, %s840_s15, %s840_s15, %s841_s6  }
 0x249 PF: > { %p633_p12 = scmp.ge.s32.totalorder %s835_s25, 2  ;;  %s499_s26 = sand.u32 1, %s807_s18  }
 0x24a   : > { %s500_s3 = scalar_lea.sflag [#allocation4], %s499_s26 }
 0x24b   : > { %p628_p13 = pnand %p633_p12, %p933_p8 }
 0x24d   : > { %p629_p0 = pneg %p628_p13 }
 0x24f   : > { %802 = dma.done.wait (%p629_p0), %s500_s3, 256  }
 0x250   : > { %804 = vsyncadd (%p629_p0), %s500_s3, 4294967040  ;;  %s19_s25 = sadd.s32 1, %s835_s25   ;;  %s1055_s7 = sld [smem:[#allocation8_spill]] }
 0x251   : > { %p16_p1 = scmp.ge.s32.totalorder %s19_s25, 6   ;;  %s1056_s18 = smov %s811_s19 }
 0x252   : > { %s1057_s19 = smov %s815_s20  ;;  %s1058_s20 = smov %s954_s16 }
 0x253   : > { %s1059_s21 = smov %s827_s23  ;;  %s1060_s22 = smov %s831_s24 }
 0x254   : > { %s1061_s23 = smov %s1064_s28  ;;  %18 = sbr.rel (!%p16_p1) target bundleno = 8 (0x8), region = 84 }
 0x256   : > { %s1062_s24 = smov %s1055_s7 }
 0x259   :  { %506 = vsyncpa [#allocation3], 1 }
 0x25a   :  { %508 = vsyncpa [#allocation3 + $0x1], 1 }
 0x25b   :  { %509 = vsyncpa [#allocation4], 1 }
 0x25c   :  { %511 = vsyncpa [#allocation4 + $0x1], 1 }

</bundles_post_ra>
